<compile_context>
chip_gen: v7x
topology: tpu7x:2x2x1
jax: 0.10.0
libtpu: 0.0.40
codegen_flags: <defaults>
</compile_context>

<pallas_src>
import jax
import jax.numpy as jnp
from jax.experimental import pallas as pl
from jax.experimental.pallas import tpu as pltpu


def _round_up(x, m):
    return (x + m - 1) // m * m


def _cdiv(a, b):
    return -(-a // b)


def _vmem_capacity_bytes():
    """Per-core VMEM capacity; conservative (v7x) fallback if query fails."""
    try:
        return int(pltpu.get_tpu_info().vmem_capacity_bytes)
    except Exception:
        return 64 * 1024 * 1024


def _conv_bn_relu_kernel(p_ref, w_ref, shift_ref, o_ref, acc_ref):
    """K-tiled im2col-matmul on the MXU (f32 accumulator) + BN-shift + ReLU."""

    @pl.when(pl.program_id(1) == 0)
    def _init():
        acc_ref[...] = jnp.zeros_like(acc_ref)

    acc_ref[...] += jnp.dot(p_ref[...], w_ref[...],
                            preferred_element_type=jnp.float32)

    @pl.when(pl.program_id(1) == pl.num_programs(1) - 1)
    def _finalize():
        y = acc_ref[...] + shift_ref[...]            # BN scale folded into W
        o_ref[...] = jnp.maximum(y, 0.0).astype(o_ref.dtype)


def resnet_bottom_forward(x, params, *, ksize=5, stride=2, pad=2,
                          compute_dtype=jnp.bfloat16, channels_last=False):
    """Conv(5x5, s=2, p=2, bias) -> BatchNorm(eval) -> ReLU.

    x: NCHW (default, matches PyTorch) or NHWC if channels_last=True.
    params: (w, b, gamma, beta, running_mean, running_var, eps).
    """
    w, b, gamma, beta, rmean, rvar, eps = params
    Cout, Cin = w.shape[0], w.shape[1]

    x_nhwc = x if channels_last else jnp.transpose(x, (0, 2, 3, 1))
    N, H, W_, _ = x_nhwc.shape
    OH = (H + 2 * pad - ksize) // stride + 1
    OW = (W_ + 2 * pad - ksize) // stride + 1

    # ---- glue: im2col in compute_dtype (bf16 halves its HBM materialization)
    x_c = x_nhwc.astype(compute_dtype)
    xp = jnp.pad(x_c, ((0, 0), (pad, pad), (pad, pad), (0, 0)))
    cols = []
    for kh in range(ksize):
        for kw in range(ksize):
            cols.append(xp[:,
                           kh:kh + stride * (OH - 1) + 1:stride,
                           kw:kw + stride * (OW - 1) + 1:stride,
                           :])
    # (kh, kw, cin) ordering matches the (2, 3, 1, 0) weight transpose below.
    patches = jnp.stack(cols, axis=3).reshape(N * OH * OW, ksize * ksize * Cin)

    # Fold conv bias + BatchNorm (eval) into per-channel weight scale & shift.
    scale = gamma / jnp.sqrt(rvar + eps)                        # (Cout,)
    shift = (beta + scale * (b - rmean)).astype(jnp.float32)    # (Cout,)
    wmat = jnp.transpose(w, (2, 3, 1, 0)).reshape(ksize * ksize * Cin, Cout)
    wmat = (wmat * scale[None, :]).astype(compute_dtype)        # scale folded

    M, K = patches.shape
    out_dtype = x.dtype
    in_item = jnp.dtype(compute_dtype).itemsize
    out_item = jnp.dtype(out_dtype).itemsize

    # ---- tiling decisions -----------------------------------------------
    LANE = 128
    Cout_pad = _round_up(Cout, LANE)

    # K tiling: single full-K block when small (padded to a multiple of 16,
    # NOT 128 -> no zero-byte blow-up at small Cin); 128-aligned tiles with an
    # accumulator when large (keeps v7x's 64 MiB VMEM happy).
    max_tile_k = 2048
    if K <= max_tile_k:
        n_k = 1
        tile_k = _round_up(K, 16)
    else:
        n_k = _cdiv(K, max_tile_k)
        tile_k = _round_up(_cdiv(K, n_k), LANE)
    K_pad = tile_k * n_k

    # M tiling: biggest tile that fits the per-generation VMEM buffer budget
    # (double-buffered LHS/RHS/out + f32 accumulator + shift row).
    vmem_cap = _vmem_capacity_bytes()
    budget = min(vmem_cap // 2, 48 * 1024 * 1024)
    fixed = 2 * tile_k * Cout_pad * in_item + 2 * Cout_pad * 4
    per_row = 2 * tile_k * in_item + 2 * Cout_pad * out_item + Cout_pad * 4
    tile_m = max(16, min(1024, max(0, budget - fixed) // per_row // 16 * 16))
    tile_m = min(tile_m, _round_up(M, 16))
    if _cdiv(M, tile_m) < 2:
        # Guarantee >= 2 M tiles so the "parallel" axis shards across both
        # TensorCores on v7x (per-step overhead is ~0.35 us, negligible).
        tile_m = max(16, _round_up(_cdiv(M, 2), 16))
    M_pad = _round_up(M, tile_m)
    n_m = M_pad // tile_m

    # ---- alignment padding (zeros are harmless / sliced off) ------------
    patches_p = jnp.pad(patches, ((0, M_pad - M), (0, K_pad - K)))
    wmat_p = jnp.pad(wmat, ((0, K_pad - K), (0, Cout_pad - Cout)))
    shift_p = jnp.pad(shift, (0, Cout_pad - Cout)).reshape(1, Cout_pad)

    est_vmem = (2 * tile_m * tile_k * in_item          # LHS (double-buffered)
                + 2 * tile_k * Cout_pad * in_item      # RHS
                + 2 * tile_m * Cout_pad * out_item     # output
                + tile_m * Cout_pad * 4                # f32 accumulator
                + 2 * Cout_pad * 4)                    # shift row
    vmem_limit = int(min(vmem_cap * 3 // 4,
                         max(2 * est_vmem + (4 << 20), 32 << 20)))

    cost = pl.CostEstimate(
        flops=2 * M_pad * K_pad * Cout_pad,
        transcendentals=0,
        bytes_accessed=(M_pad * K_pad * in_item + K_pad * Cout_pad * in_item
                        + M_pad * Cout_pad * out_item + Cout_pad * 4),
    )

    # ---- hot path: tiled Pallas kernel (matmul + BN shift + ReLU) --------
    out_flat = pl.pallas_call(
        _conv_bn_relu_kernel,
        out_shape=jax.ShapeDtypeStruct((M_pad, Cout_pad), out_dtype),
        grid_spec=pltpu.PrefetchScalarGridSpec(
            num_scalar_prefetch=0,
            grid=(n_m, n_k),
            in_specs=[
                pl.BlockSpec((tile_m, tile_k), lambda i, k: (i, k)),   # patches
                pl.BlockSpec((tile_k, Cout_pad), lambda i, k: (k, 0)),  # weights
                pl.BlockSpec((1, Cout_pad), lambda i, k: (0, 0)),       # BN shift
            ],
            out_specs=pl.BlockSpec((tile_m, Cout_pad), lambda i, k: (i, 0)),
            scratch_shapes=[pltpu.VMEM((tile_m, Cout_pad), jnp.float32)],
        ),
        compiler_params=pltpu.CompilerParams(
            dimension_semantics=("parallel", "arbitrary"),
            vmem_limit_bytes=vmem_limit,
        ),
        cost_estimate=cost,
    )(patches_p, wmat_p, shift_p)

    out_flat = out_flat[:M, :Cout]          # drop padded rows/channels
    out_nhwc = out_flat.reshape(N, OH, OW, Cout)
    if channels_last:
        return out_nhwc                     # lane-dense, no extra HBM pass
    return out_nhwc.transpose(0, 3, 1, 2)   # back to PyTorch's NCHW


def _reference_forward(x_nchw, params, *, ksize=5, stride=2, pad=2):
    """Pure-JAX reference (lax conv) to sanity-check the Pallas result."""
    w, b, gamma, beta, rmean, rvar, eps = params
    y = jax.lax.conv_general_dilated(
        x_nchw, w, window_strides=(stride, stride),
        padding=((pad, pad), (pad, pad)),
        dimension_numbers=("NCHW", "OIHW", "NCHW"))
    y = y + b[None, :, None, None]
    y = (y - rmean[None, :, None, None]) / jnp.sqrt(rvar + eps)[None, :, None, None]
    y = gamma[None, :, None, None] * y + beta[None, :, None, None]
    return jnp.maximum(y, 0.0)


if __name__ == "__main__":
    inchannels, outchannels, ksize = 1, 128, 5
    N, H, W = 2, 16, 16

    key = jax.random.PRNGKey(0)
    kx, kw, kb, kg, kbe, km, kv = jax.random.split(key, 7)

    x = jax.random.normal(kx, (N, inchannels, H, W), dtype=jnp.float32)

    # Deterministic synthetic parameters (shapes follow nn.Conv2d / BatchNorm2d).
    w = 0.05 * jax.random.normal(kw, (outchannels, inchannels, ksize, ksize),
                                 dtype=jnp.float32)
    b = 0.01 * jax.random.normal(kb, (outchannels,), dtype=jnp.float32)
    gamma = 1.0 + 0.1 * jax.random.normal(kg, (outchannels,), dtype=jnp.float32)
    beta = 0.05 * jax.random.normal(kbe, (outchannels,), dtype=jnp.float32)
    rmean = 0.02 * jax.random.normal(km, (outchannels,), dtype=jnp.float32)
    rvar = 1.0 + 0.1 * jnp.abs(jax.random.normal(kv, (outchannels,),
                                                 dtype=jnp.float32))
    eps = 1e-5
    params = (w, b, gamma, beta, rmean, rvar, eps)

    fwd = jax.jit(resnet_bottom_forward,
                  static_argnames=("ksize", "stride", "pad",
                                   "compute_dtype", "channels_last"))

    # Default (bf16 operands, f32 accumulation) — the fast path.
    out_bf16 = jax.block_until_ready(fwd(x, params))
    # f32 operands — tight numerical check of the kernel structure.
    out_f32 = jax.block_until_ready(fwd(x, params, compute_dtype=jnp.float32))

    ref = jax.block_until_ready(_reference_forward(x, params))

    assert out_bf16.shape == (N, outchannels, H // 2, W // 2), out_bf16.shape
    assert out_f32.shape == (N, outchannels, H // 2, W // 2), out_f32.shape
    assert jnp.allclose(out_f32, ref, atol=1e-4, rtol=1e-4), \
        "f32 kernel mismatch vs reference"
    assert jnp.allclose(out_bf16, ref, atol=5e-2, rtol=5e-2), \
        "bf16 kernel mismatch vs reference"

    print("KERNEL_OK")
</pallas_src>

<mosaic_0001>
module attributes {stable_mosaic.version = 11 : i64} {
  func.func @_conv_bn_relu_kernel(%arg0: i32, %arg1: i32, %arg2: memref<64x32xbf16, #tpu.memory_space<vmem>>, %arg3: memref<32x128xbf16, #tpu.memory_space<vmem>>, %arg4: memref<1x128xf32, #tpu.memory_space<vmem>>, %arg5: memref<64x128xf32, #tpu.memory_space<vmem>>, %arg6: memref<64x128xf32, #tpu.memory_space<vmem>>) attributes {dimension_semantics = [#tpu.dimension_semantics<parallel>, #tpu.dimension_semantics<arbitrary>], iteration_bounds = array<i64: 2, 1>, scalar_prefetch = 0 : i64, scratch_operands = 1 : i64, tpu.core_type = #tpu.core_type<tc>, window_params = [{transform_indices = @transform_0, window_bounds = array<i64: 64, 32>}, {transform_indices = @transform_1, window_bounds = array<i64: 32, 128>}, {pipeline_mode = #tpu.pipeline_mode<synchronous>, transform_indices = @transform_2, window_bounds = array<i64: 1, 128>}, {transform_indices = @transform_3, window_bounds = array<i64: 64, 128>}]} {
    %c0_i32 = arith.constant 0 : i32
    %0 = arith.cmpi eq, %arg1, %c0_i32 : i32
    %1 = arith.extui %0 : i1 to i32
    %c0_i32_0 = arith.constant 0 : i32
    %2 = arith.cmpi ne, %1, %c0_i32_0 : i32
    scf.if %2 {
      %cst_10 = arith.constant 0.000000e+00 : f32
      %12 = vector.broadcast %cst_10 : f32 to vector<64x128xf32>
      %c0_11 = arith.constant 0 : index
      %c0_12 = arith.constant 0 : index
      %13 = vector.load %arg6[%c0_11, %c0_12] : memref<64x128xf32, #tpu.memory_space<vmem>>, vector<64x128xf32>
      tpu.vector_store %arg6[%c0_11, %c0_12], %12 {strides = array<i32>} : memref<64x128xf32, #tpu.memory_space<vmem>>, vector<64x128xf32>,
    } else {
    }
    %c0 = arith.constant 0 : index
    %c0_1 = arith.constant 0 : index
    %3 = vector.load %arg6[%c0, %c0_1] : memref<64x128xf32, #tpu.memory_space<vmem>>, vector<64x128xf32>
    %c0_2 = arith.constant 0 : index
    %c0_3 = arith.constant 0 : index
    %4 = vector.load %arg2[%c0_2, %c0_3] : memref<64x32xbf16, #tpu.memory_space<vmem>>, vector<64x32xbf16>
    %c0_4 = arith.constant 0 : index
    %c0_5 = arith.constant 0 : index
    %5 = vector.load %arg3[%c0_4, %c0_5] : memref<32x128xbf16, #tpu.memory_space<vmem>>, vector<32x128xbf16>
    %cst = arith.constant dense<0.000000e+00> : vector<64x128xf32>
    %6 = tpu.matmul %4, %5, %cst {dimension_numbers = #tpu.dot_dimension_numbers<[1], [0], [0], [1], [0, 0, 1, 1], [], []>} : vector<64x32xbf16>, vector<32x128xbf16>, vector<64x128xf32> -> vector<64x128xf32>
    %7 = arith.addf %3, %6 : vector<64x128xf32>
    %c0_6 = arith.constant 0 : index
    %c0_7 = arith.constant 0 : index
    %8 = vector.load %arg6[%c0_6, %c0_7] : memref<64x128xf32, #tpu.memory_space<vmem>>, vector<64x128xf32>
    tpu.vector_store %arg6[%c0_6, %c0_7], %7 {strides = array<i32>} : memref<64x128xf32, #tpu.memory_space<vmem>>, vector<64x128xf32>,
    %c0_i32_8 = arith.constant 0 : i32
    %9 = arith.cmpi eq, %arg1, %c0_i32_8 : i32
    %10 = arith.extui %9 : i1 to i32
    %c0_i32_9 = arith.constant 0 : i32
    %11 = arith.cmpi ne, %10, %c0_i32_9 : i32
    scf.if %11 {
      %c0_10 = arith.constant 0 : index
      %c0_11 = arith.constant 0 : index
      %12 = vector.load %arg6[%c0_10, %c0_11] : memref<64x128xf32, #tpu.memory_space<vmem>>, vector<64x128xf32>
      %c0_12 = arith.constant 0 : index
      %c0_13 = arith.constant 0 : index
      %13 = vector.load %arg4[%c0_12, %c0_13] : memref<1x128xf32, #tpu.memory_space<vmem>>, vector<1x128xf32>
      %14 = vector.broadcast %13 : vector<1x128xf32> to vector<64x128xf32>
      %15 = arith.addf %12, %14 : vector<64x128xf32>
      %cst_14 = arith.constant 0.000000e+00 : f32
      %16 = vector.broadcast %cst_14 : f32 to vector<64x128xf32>
      %17 = arith.maximumf %15, %16 : vector<64x128xf32>
      %c0_15 = arith.constant 0 : index
      %c0_16 = arith.constant 0 : index
      %18 = vector.load %arg5[%c0_15, %c0_16] : memref<64x128xf32, #tpu.memory_space<vmem>>, vector<64x128xf32>
      tpu.vector_store %arg5[%c0_15, %c0_16], %17 {strides = array<i32>} : memref<64x128xf32, #tpu.memory_space<vmem>>, vector<64x128xf32>,
    } else {
    }
    return
  }
  func.func @transform_0(%arg0: i32, %arg1: i32) -> (i32, i32) {
    %c0_i32 = arith.constant 0 : i32
    return %arg0, %arg1 : i32, i32
  }
  func.func @transform_1(%arg0: i32, %arg1: i32) -> (i32, i32) {
    %c0_i32 = arith.constant 0 : i32
    %c0_i32_0 = arith.constant 0 : i32
    return %arg1, %c0_i32 : i32, i32
  }
  func.func @transform_2(%arg0: i32, %arg1: i32) -> (i32, i32) {
    %c0_i32 = arith.constant 0 : i32
    %c0_i32_0 = arith.constant 0 : i32
    %c0_i32_1 = arith.constant 0 : i32
    return %c0_i32, %c0_i32_0 : i32, i32
  }
  func.func @transform_3(%arg0: i32, %arg1: i32) -> (i32, i32) {
    %c0_i32 = arith.constant 0 : i32
    %c0_i32_0 = arith.constant 0 : i32
    return %arg0, %c0_i32 : i32, i32
  }
}

</mosaic_0001>

<bundles_post_ra>
// kernel: resnet_bottom_forward.1
= control target key start
LH: loop header
LB: loop body
LE: loop exit
PB: predicated region body
PF: predicated region fallthrough
CT: control target
= control target key end

     0   :  { %8 = vsyncpa [#allocation4], 0  ;;  %s861_s0 = inlined_call_operand.vmem [shape: bf16[128,32], index: 0, kind: input, shape index: {}]   ;;  %s862_s1 = inlined_call_operand.vmem [shape: bf16[32,128], index: 1, kind: input, shape index: {}]   ;;  %s863_s2 = inlined_call_operand.vmem [shape: f32[1,128], index: 2, kind: input, shape index: {}]   ;;  %s864_s3 = inlined_call_operand.hbm [shape: f32[128,128], index: 3, kind: output, shape index: {}]  }
   0x1   :  { %10 = vsyncpa [#allocation4 + $0x1], 0  ;;  %s734_s12 = smov 0   ;;  %s736_s13 = smov 0  }
   0x2   :  { %s738_s14 = smov 0   ;;  %s740_s15 = smov 0  }
   0x3   :  { %s742_s16 = smov 0   ;;  %s744_s17 = smov 0  }
   0x4 LB: > { %s520_s18 = sadd.s32 4294967295, %s709_s17   ;;  %s521_s19 = sadd.s32 4294967294, %s709_s17   ;;  %s709_s17 = sphi %s744_s17, %s16_s17   ;;  %s705_s16 = sphi %s742_s16, %s871_s16   ;;  %s701_s15 = sphi %s740_s15, %s870_s15   ;;  %s697_s14 = sphi %s738_s14, %s869_s14   ;;  %s693_s13 = sphi %s736_s13, %s868_s13   ;;  %s689_s12 = sphi %s734_s12, %s867_s12  }
   0x5   : > { %s28_s20 = sadd.s32 1, %s705_s16  ;;  %s110_s21 = sadd.s32 1, %s697_s14 }
   0x6   : > { %p30_p0 = scmp.ge.s32.totalorder %s28_s20, 2  ;;  %p120_p1 = scmp.ne.s32.totalorder %s697_s14, %s693_s13 }
   0x7   : > { %p121_p2 = scmp.eq.s32.totalorder %s520_s18, 1  ;;  %p126_p3 = scmp.ne.s32.totalorder %s693_s13, %s689_s12 }
   0x8   : > { %s873_s20 = smov (%p30_p0, %s28_s20), 0  ;;  %p127_p5 = scmp.eq.s32.totalorder %s521_s19, 1 }
   0x9   : > { %p774_p4 = por %p121_p2, %p120_p1  ;;  %s107_s23 = ssub.s32 %s705_s16, %s873_s20 }
   0xa   : > { %p525_p6 = scmp.ge.s32.totalorder %s709_s17, 1  ;;  %p108_p7 = scmp.eq.s32.totalorder %s107_s23, 0 }
   0xb   : > { %p781_p8 = por %p127_p5, %p126_p3  ;;  %p169_p9 = scmp.lt.s32.totalorder %s709_s17, 3 }
   0xc   : > { %s787_s25 = scalar_select %p108_p7, %s697_s14, %s110_s21  }
   0xd   : > { %p170_p10 = pnand %p525_p6, %p169_p9 }
   0xe   : > { %v625_v0 = vld [vmem:[%s862_s1] sm:$0xff] (!%p170_p10)   ;;  %s527_s28 = sshll.u32 (!%p170_p10), %s701_s15, 3  ;;  %v626_v1 = vld [vmem:[%s862_s1 + $0x8] sm:$0xff] (!%p170_p10)   ;;  %vm282_vm0 = vcmask (!%p170_p10), 261120   ;;  %s198_s8 = sand.u32 (!%p170_p10), 1, %s693_s13  }
   0xf   : > { %173 = sbr.rel (%p170_p10) target bundleno = 261 (0x105), region = 32  ;;  %p202_p11 = scmp.lt.s32.totalorder (!%p170_p10), %s527_s28, 15  ;;  %552 = vmatprep.subr.bf16.mxu0 (!%p170_p10), %v625_v0  ;;  %564 = vmatprep.subr.bf16.mxu1 (!%p170_p10), %v625_v0  ;;  %v539_v6 = vld [vmem:[%s863_s2] ss:$0 sm:$0xff] (!%p170_p10) }
  0x10   : > { %553 = vmatpush3.bf16.msra.mxu0 (!%p170_p10), %v625_v0  ;;  %566 = vmatpush3.bf16.msra.mxu1 (!%p170_p10), %v625_v0  ;;  %s526_s11 = sshll.u32 (!%p170_p10), %s198_s8, 6  ;;  %s545_s18 = sshll.u32 (!%p170_p10), %s701_s15, 10 }
  0x11   : > { %554 = vmatprep.subr.bf16.mxu0 (!%p170_p10), %v626_v1  ;;  %565 = vmatprep.subr.bf16.mxu1 (!%p170_p10), %v626_v1  ;;  %s200_s19 = scalar_lea.vmem (!%p170_p10), [#allocation3], %s526_s11  ;;  %s809_s15 = scalar_lea.hbm (!%p170_p10), %s864_s3, %s545_s18 }
  0x12   : > { %s432_s21 = sshll.u32 (!%p170_p10), %s200_s19, 4  ;;  %s815_s27 = scalar_lea.sflag (!%p170_p10), [#allocation4], %s198_s8  ;;  %s811_s21 = int_to_ptr.vmem [resolvable:$true] %s432_s21 }
  0x13   : > { %s711_s29 = smov (!%p170_p10), [#allocation3]  }
  0x14   : > { %555 = vmatpush3.bf16.msra.mxu0 (!%p170_p10), %v626_v1  ;;  %567 = vmatpush3.bf16.msra.mxu1 (!%p170_p10), %v626_v1  ;;  %s635_s30 = sshll.u32 (!%p170_p10), %s711_s29, 4  ;;  %s636_s30 = int_to_ptr.vmem [resolvable:$false] %s635_s30 }
  0x15   : > { %p638_p1 = scmp.lt.s32.totalorder (!%p170_p10), %s811_s21, %s636_s30 }
  0x16   : > { %s875_s28 = smov (!%p202_p11, %s527_s28), 15 }
  0x17   : > { %s528_s4 = sshll.u32 %s875_s28, 2  ;;  %s631_s28 = scalar_lea.vmem %s811_s21, 1024 }
  0x18   : > { %s208_s7 = scalar_lea.vmem %s861_s0, %s528_s4  ;;  %p632_p12 = scmp.ne.s32.totalorder %s811_s21, %s631_s28 }
  0x19   : > { %v627_v2 = vld [vmem:[%s208_s7] sm:$0xff]   ;;  %v628_v3 = vld [vmem:[%s208_s7 + $0x10] sm:$0xff]   ;;  %v629_v4 = vld [vmem:[%s208_s7 + $0x8] sm:$0xff]   ;;  %s637_s4 = scalar_lea.vmem %s636_s30, 2048 }
  0x1a   : > { %556 = vmatprep.mubr.msk.bf16.mxu0 %vm282_vm0, %v627_v2  ;;  %560 = vmatprep.mubr.msk.bf16.mxu1 %vm282_vm0, %v628_v3  ;;  %v630_v5 = vld [vmem:[%s208_s7 + $0x18] sm:$0xff]   ;;  %p633_p13 = pnand %p632_p12, %p774_p4  ;;  %p639_p2 = scmp.lt.s32.totalorder %s637_s4, %s631_s28 }
  0x1b   : > { %557 = vmatmul.mubr.msk.bf16.vlgmr.msra.gmra.mrb[0].mxu0 %vm282_vm0, %v629_v4  ;;  %561 = vmatmul.mubr.msk.bf16.vlgmr.msra.gmra.mrb[0].mxu1 %vm282_vm0, %v630_v5 }
  0x1c   : > { %p634_p0 = pneg %p633_p13  ;;  %p640_p3 = por %p639_p2, %p638_p1 }
  0x1e   : > { %p641_p5 = pnand %p640_p3, %p634_p0 }
  0xee   : > { %v558_v7 = vpop.f32.mrb[0].mxu0  ;;  %v562_v9 = vpop.f32.mrb[0].mxu1 }
  0xef   : > { %v396_v8 = vadd.f32 %v558_v7, %v539_v6  ;;  %v329_v10 = vpop.f32.mrb[1].mxu0  ;;  %v400_v11 = vadd.f32 %v562_v9, %v539_v6  ;;  %v345_v13 = vpop.f32.mrb[1].mxu1 }
  0xf0   : > { %v394_v12 = vadd.f32 %v539_v6, %v329_v10  ;;  %v559_v14 = vpop.f32.mrb[2].mxu0  ;;  %v398_v16 = vadd.f32 %v539_v6, %v345_v13  ;;  %v563_v18 = vpop.f32.mrb[2].mxu1 }
  0xf1   : > { %v404_v15 = vmax.f32 %v396_v8, 0.0  ;;  %v397_v17 = vadd.f32 %v559_v14, %v539_v6  ;;  %v332_v19 = vpop.f32.mrb[3].mxu0  ;;  %v408_v20 = vmax.f32 %v400_v11, 0.0  ;;  %v401_v22 = vadd.f32 %v563_v18, %v539_v6  ;;  %v348_v24 = vpop.f32.mrb[3].mxu1 }
  0xf2   : > { %v402_v21 = vmax.f32 %v394_v12, 0.0  ;;  %v395_v23 = vadd.f32 %v539_v6, %v332_v19  ;;  %v406_v25 = vmax.f32 %v398_v16, 0.0  ;;  %v399_v27 = vadd.f32 %v539_v6, %v348_v24 }
  0xf3   : > { %412 = vst [vmem:[%s200_s19 + $0x10] sm:$0xff] %v404_v15  ;;  %v405_v26 = vmax.f32 %v397_v17, 0.0  ;;  %416 = vst [vmem:[%s200_s19 + $0x30] sm:$0xff] %v408_v20  ;;  %v409_v28 = vmax.f32 %v401_v22, 0.0 }
  0xf4   : > { %410 = vst [vmem:[%s200_s19] sm:$0xff] %v402_v21  ;;  %v403_v29 = vmax.f32 %v395_v23, 0.0  ;;  %414 = vst [vmem:[%s200_s19 + $0x20] sm:$0xff] %v406_v25  ;;  %v407_v30 = vmax.f32 %v399_v27, 0.0 }
  0xf5   : > { %413 = vst [vmem:[%s200_s19 + $0x18] sm:$0xff] %v405_v26  ;;  %417 = vst [vmem:[%s200_s19 + $0x38] sm:$0xff] %v409_v28 }
  0xf6   : > { %411 = vst [vmem:[%s200_s19 + $0x8] sm:$0xff] %v403_v29  ;;  %415 = vst [vmem:[%s200_s19 + $0x28] sm:$0xff] %v407_v30 }
  0xf7   : > { %644 = shalt.err (!%p641_p5)
}
  0xf8   : > { %s645_s5 = scalar_lea.hbm %s809_s15, 1024  ;;  %s649_s8 = scalar_lea.hbm %s864_s3, 2048 }
  0xf9   : > { %p646_p6 = scmp.ne.s32.totalorder %s809_s15, %s645_s5  ;;  %p650_p10 = scmp.lt.u32.totalorder %s809_s15, %s864_s3 }
  0xfa   : > { %p651_p11 = scmp.lt.u32.totalorder %s649_s8, %s645_s5  ;;  %p653_p13 = scmp.lt.u32.totalorder %s645_s5, %s809_s15 }
  0xfb   : > { %p647_p7 = pnand %p646_p6, %p774_p4 }
  0xfc   : > { %p652_p12 = por %p651_p11, %p650_p10 }
  0xfd   : > { %p648_p9 = pneg %p647_p7 }
  0xfe   : > { %p654_p0 = por %p653_p13, %p652_p12 }
 0x100   : > { %p655_p1 = pnand %p654_p0, %p648_p9 }
 0x102   : > { %658 = shalt.err (!%p655_p1)
}
 0x103   : > { %s712_s11 = smov 128   ;;  %s713_s18 = smov 8  }
 0x104   : > { %568 = dma.vmem_to_hbm [thread:$0]  (%p774_p4), %s811_s21, 1024, %s809_s15, %s815_s27, %s712_s11, %s712_s11, %s713_s18  }
 0x105 PF: > { %p574_p2 = scmp.ge.s32.totalorder %s709_s17, 2  ;;  %s447_s19 = sand.u32 1, %s689_s12  }
 0x106   : > { %s448_s23 = scalar_lea.sflag [#allocation4], %s447_s19 }
 0x107   : > { %p571_p3 = pnand %p574_p2, %p781_p8 }
 0x109   : > { %684 = dma.done.wait (!%p571_p3), %s448_s23, 1024  }
 0x10a   : > { %686 = vsyncadd (!%p571_p3), %s448_s23, 4294966272  ;;  %s16_s17 = sadd.s32 1, %s709_s17   ;;  %s867_s12 = smov %s693_s13 }
 0x10b   : > { %p13_p5 = scmp.ge.s32.totalorder %s16_s17, 4   ;;  %s868_s13 = smov %s697_s14 }
 0x10c   : > { %s869_s14 = smov %s787_s25  ;;  %s870_s15 = smov %s705_s16 }
 0x10d   : > { %s871_s16 = smov %s873_s20  ;;  %15 = sbr.rel (!%p13_p5) target bundleno = 4 (0x4), region = 78 }
 0x114   :  { %453 = vsyncpa [#allocation4], 1 }
 0x115   :  { %455 = vsyncpa [#allocation4 + $0x1], 1 }

</bundles_post_ra>
